<compile_context>
chip_gen: v7x
topology: tpu7x:2x2x1
jax: 0.10.0
libtpu: 0.0.40
codegen_flags: <defaults>
</compile_context>

<pallas_src>
import jax
import jax.numpy as jnp
from jax.experimental import pallas as pl
from jax.experimental.pallas import tpu as pltpu


# Dtypes known to lower cleanly for a whole-array HBM->HBM DMA copy.
_SUPPORTED_DTYPES = {
    jnp.dtype("float32"), jnp.dtype("bfloat16"), jnp.dtype("float16"),
    jnp.dtype("int32"), jnp.dtype("uint32"),
    jnp.dtype("int16"), jnp.dtype("uint16"),
    jnp.dtype("int8"), jnp.dtype("uint8"),
}


def _identity_dma_kernel(x_hbm, o_hbm, sem):
    # Identity "hot path": a single HBM->HBM DMA of the whole array.
    cp = pltpu.make_async_copy(x_hbm, o_hbm, sem)
    cp.start()
    cp.wait()


@jax.jit
def identity_pallas(x):
    """Identity.forward(x): returns x unchanged (bit-exact copy)."""
    # Shape/dtype/size are static under jit, so these branches are free.
    if x.size == 0 or jnp.dtype(x.dtype) not in _SUPPORTED_DTYPES:
        # Zero-size or exotic dtypes (bool / sub-byte / fp8): nothing to copy,
        # or the DMA path may not lower — Identity's answer is simply x.
        return x

    return pl.pallas_call(
        _identity_dma_kernel,
        out_shape=jax.ShapeDtypeStruct(x.shape, x.dtype),
        in_specs=[pl.BlockSpec(memory_space=pl.ANY)],   # raw HBM ref, no auto-DMA
        out_specs=pl.BlockSpec(memory_space=pl.ANY),    # raw HBM ref, no auto-DMA
        scratch_shapes=[pltpu.SemaphoreType.DMA],       # one DMA completion sem
    )(x)


if __name__ == "__main__":
    key = jax.random.PRNGKey(0)
    k1, k2, k3 = jax.random.split(key, 3)

    # Small input consistent with the module (in_features = 2048).
    x1 = jax.random.normal(k1, (8, 2048), dtype=jnp.float32)
    y1 = jax.block_until_ready(identity_pallas(x1))
    assert y1.shape == x1.shape and y1.dtype == x1.dtype
    assert bool(jnp.all(y1 == x1))

    # Rows not a multiple of the sublane packing, lanes aligned, bf16:
    # no padding / slicing anywhere — the DMA copies the buffer as-is.
    x2 = jax.random.normal(k2, (5, 2048), dtype=jnp.bfloat16)
    y2 = jax.block_until_ready(identity_pallas(x2))
    assert y2.shape == x2.shape and y2.dtype == x2.dtype
    assert bool(jnp.all(y2 == x2))

    # Fully ragged shape (no dim a multiple of 8 or 128): still one HBM->HBM
    # DMA, since the ANY-space path has no tiling constraints.
    x3 = jax.random.normal(k3, (3, 7, 100), dtype=jnp.float32)
    y3 = jax.block_until_ready(identity_pallas(x3))
    assert y3.shape == x3.shape and y3.dtype == x3.dtype
    assert bool(jnp.all(y3 == x3))

    # Unsupported-dtype fallback: returns x unchanged without launching a kernel.
    x4 = (jnp.arange(16, dtype=jnp.int32) % 2) == 0
    y4 = jax.block_until_ready(identity_pallas(x4))
    assert y4.dtype == x4.dtype and bool(jnp.all(y4 == x4))

    print("KERNEL_OK")
</pallas_src>

<mosaic_0001>
module attributes {stable_mosaic.version = 11 : i64} {
  func.func @_identity_dma_kernel(%arg0: memref<8x2048xf32, #tpu.memory_space<any>>, %arg1: memref<8x2048xf32, #tpu.memory_space<any>>, %arg2: memref<!tpu.dma_semaphore, #tpu.memory_space<semaphore_mem>>) attributes {dimension_semantics = [], scalar_prefetch = 0 : i64, scratch_operands = 1 : i64, tpu.core_type = #tpu.core_type<tc>} {
    tpu.enqueue_dma source(%arg0 : memref<8x2048xf32, #tpu.memory_space<any>>) target(%arg1 : memref<8x2048xf32, #tpu.memory_space<any>>) target_semaphore(%arg2 : memref<!tpu.dma_semaphore, #tpu.memory_space<semaphore_mem>>)
    tpu.wait_dma2 semaphore(%arg2 : memref<!tpu.dma_semaphore, #tpu.memory_space<semaphore_mem>>) src(%arg0 : memref<8x2048xf32, #tpu.memory_space<any>>) dst(%arg1 : memref<8x2048xf32, #tpu.memory_space<any>>)
    return
  }
}

</mosaic_0001>

<bundles_post_ra>
// kernel: identity_pallas.1
= control target key start
LH: loop header
LB: loop body
LE: loop exit
PB: predicated region body
PF: predicated region fallthrough
CT: control target
= control target key end

     0   :  { %s35_s6 = smov [#allocation2]   ;;  %s36_s7 = smov [#allocation3]   ;;  %s54_s0 = inlined_call_operand.hbm [shape: f32[8,2048], index: 0, kind: input, shape index: {}]   ;;  %s55_s1 = inlined_call_operand.hbm [shape: f32[8,2048], index: 1, kind: output, shape index: {}]  }
   0x1   :  { %s37_s8 = smov 0  }
   0x2   :  { %18 = dma.general %s54_s0, 2048, %s55_s1, %s35_s6, %s36_s7, [#allocation4], %s37_s8, 0  }
   0x3   :  { %33 = dma.done.wait [#allocation2], 2048 }
   0x4   :  { %34 = vsyncadd [#allocation2], 4294965248 }
   0x5   :  { %23 = vsyncmov [#allocation2] }
   0x8   :  { %s24_s13 = vpop.sfrf %23 }
   0x9   :  { %p29_p0 = scmp.ne.s32.totalorder %s24_s13, 0 }
   0xb   :  { %28 = shalt.err (%p29_p0)  }

</bundles_post_ra>
